<compile_context>
chip_gen: v6e
topology: v6e:2x2x1
jax: 0.10.0
libtpu: 0.0.40
codegen_flags: <defaults>
</compile_context>

<pallas_src>
import functools

import jax
import jax.numpy as jnp
from jax.experimental import pallas as pl
from jax.experimental.pallas import tpu as pltpu

LANE = 128
SUBLANE = 8


def _cdiv(a, b):
    return -(-a // b)


def _dual_att_loss_kernel(*refs, num_maps, tr, n_valid, need_mask):
    """Per-tile: mean over M maps + stable BCE-with-logits + (8,128) partial."""
    map_refs = refs[:num_maps]
    tgt_ref = refs[num_maps]
    out_ref = refs[num_maps + 1]

    # mean over the M maps (per-tile cast so bf16 maps stream at half bandwidth)
    x = map_refs[0][...].astype(jnp.float32)
    for r in map_refs[1:]:
        x = x + r[...].astype(jnp.float32)
    x = x * (1.0 / num_maps)

    # target: either a (tr, 1) per-row column (lane-broadcast) or dense (tr, 128)
    z = tgt_ref[...].astype(jnp.float32)

    # numerically stable binary_cross_entropy_with_logits (pos_weight=None)
    loss = jnp.maximum(x, 0.0) - x * z + jnp.log1p(jnp.exp(-jnp.abs(x)))

    def _partial(l):
        # (tr, 128) -> (8, 128): sublane-group adds only (pure VALU, no XLU).
        return jnp.sum(l.reshape(tr // SUBLANE, SUBLANE, LANE), axis=0)

    if not need_mask:
        out_ref[...] = _partial(loss)[None]
    else:
        i = pl.program_id(0)
        last = pl.num_programs(0) - 1

        @pl.when(i != last)
        def _():  # steady state: no mask arithmetic in the hot path
            out_ref[...] = _partial(loss)[None]

        @pl.when(i == last)
        def _():  # ragged tail: select out padded / out-of-bounds elements
            grow = jax.lax.broadcasted_iota(jnp.int32, loss.shape, 0) + i * tr
            col = jax.lax.broadcasted_iota(jnp.int32, loss.shape, 1)
            n_full = n_valid // LANE
            rem = n_valid % LANE
            valid = (grow < n_full) | ((grow == n_full) & (col < rem))
            out_ref[...] = _partial(jnp.where(valid, loss, 0.0))[None]


def dual_att_net_loss(att_maps, annotations):
    """JAX/Pallas equivalent of DualAttNetLoss.forward (default ctor args)."""
    M = len(att_maps)
    B, C, H, W = att_maps[0].shape
    HW = H * W
    n = B * C * HW

    # [B, C] hit table: class c appears in image b's (non -1) annotations.
    targets = annotations[:, :, 4].astype(jnp.int32)                    # [B, N]
    ann_valid = targets != -1
    cls = jnp.arange(C, dtype=jnp.int32)
    hit = jnp.any(
        (targets[:, :, None] == cls[None, None, :]) & ann_valid[:, :, None],
        axis=1,
    )                                                                    # [B, C]

    # Pad only when unavoidable: n not lane-aligned, or fewer than one 8x128
    # vreg group of rows.  Padding goes to the 1024 boundary so the padded row
    # count stays a multiple of 8 (keeps _partial's reshape legal).
    pad = 0
    if (n % LANE != 0) or (n < SUBLANE * LANE):
        pad = (-n) % (SUBLANE * LANE)
    flat_maps = [m.reshape(-1) for m in att_maps]         # keep native dtype
    if pad:
        flat_maps = [jnp.pad(f, (0, pad)) for f in flat_maps]
    R = (n + pad) // LANE                                  # >= 8 always
    maps2 = [f.reshape(R, LANE) for f in flat_maps]

    compact = (HW % LANE == 0)
    if compact:
        # z is constant over each (b, c) HxW plane -> one value per 128-lane
        # row; ship a tiny [R, 1] f32 column instead of a dense one-hot.
        rows_per_group = HW // LANE
        zrow = jnp.broadcast_to(
            hit.reshape(B * C, 1).astype(jnp.float32), (B * C, rows_per_group)
        ).reshape(-1)                                      # [n // 128]
        if zrow.shape[0] != R:
            zrow = jnp.pad(zrow, (0, R - zrow.shape[0]))
        tgt = zrow.reshape(R, 1)
        tgt_lane = 1
    else:
        # Fallback: dense per-element target (only when H*W % 128 != 0).
        one_hot = jnp.broadcast_to(
            hit[:, :, None, None], (B, C, H, W)
        ).astype(jnp.float32)
        tflat = one_hot.reshape(-1)
        if pad:
            tflat = jnp.pad(tflat, (0, pad))
        tgt = tflat.reshape(R, LANE)
        tgt_lane = LANE

    # --- tile sizing (dtype-aware, includes temporaries, explicit VMEM limit)
    map_bytes_per_row = sum(m.dtype.itemsize for m in att_maps) * LANE
    tgt_bytes_per_row = tgt.dtype.itemsize * tgt_lane
    # double-buffered input DMA buffers + ~4 f32 elementwise temporaries
    bytes_per_row = 2 * (map_bytes_per_row + tgt_bytes_per_row) + 4 * 4 * LANE
    budget = 20 << 20            # keeps buffers+temps well inside every gen's VMEM
    tr = max(SUBLANE, (budget // bytes_per_row) // SUBLANE * SUBLANE)
    tr = min(tr, 8192)                         # amortizes per-step cost (v6e/v7x)
    tr = min(tr, (R // SUBLANE) * SUBLANE)     # block rows never exceed the array
    # Megacore: keep >= 2 grid steps whenever there is enough work so the
    # "parallel" grid axis can split across both TensorCores (v7x).
    if _cdiv(R, tr) < 2 and R >= 2 * SUBLANE:
        tr = (((R + 1) // 2) + SUBLANE - 1) // SUBLANE * SUBLANE
    num_tiles = _cdiv(R, tr)
    need_mask = (num_tiles * tr * LANE) != n

    vmem_limit = int(min(40 << 20, max(16 << 20, bytes_per_row * tr + (4 << 20))))

    kernel = functools.partial(
        _dual_att_loss_kernel, num_maps=M, tr=tr, n_valid=n, need_mask=need_mask
    )
    in_specs = [pl.BlockSpec((tr, LANE), lambda i: (i, 0)) for _ in range(M)]
    in_specs.append(pl.BlockSpec((tr, tgt_lane), lambda i: (i, 0)))

    partials = pl.pallas_call(
        kernel,
        out_shape=jax.ShapeDtypeStruct((num_tiles, SUBLANE, LANE), jnp.float32),
        grid_spec=pltpu.PrefetchScalarGridSpec(
            num_scalar_prefetch=0,
            grid=(num_tiles,),
            in_specs=in_specs,
            out_specs=pl.BlockSpec((1, SUBLANE, LANE), lambda i: (i, 0, 0)),
        ),
        compiler_params=pltpu.CompilerParams(
            dimension_semantics=("parallel",),
            vmem_limit_bytes=vmem_limit,
        ),
    )(*maps2, tgt)

    # tiny epilogue: reduce the (num_tiles, 8, 128) partials and apply 1/n
    return jnp.sum(partials) * (1.0 / n)


if __name__ == "__main__":
    key = jax.random.PRNGKey(0)

    def run_case(B, C, H, W, M, cls_rows):
        ks = jax.random.split(key, M + 1)
        att_maps = [
            jax.random.normal(ks[m], (B, C, H, W), jnp.float32) for m in range(M)
        ]
        cls_col = jnp.array(cls_rows, dtype=jnp.float32)                 # [B, N]
        boxes = jax.random.uniform(ks[M], (B, cls_col.shape[1], 4), jnp.float32)
        annotations = jnp.concatenate([boxes, cls_col[..., None]], axis=-1)

        loss = jax.block_until_ready(dual_att_net_loss(att_maps, annotations))

        # plain-JAX reference for sanity
        x = jnp.mean(jnp.stack(att_maps, 0), 0)
        t = annotations[:, :, 4].astype(jnp.int32)
        valid = t != -1
        hit = jnp.any(
            (t[:, :, None] == jnp.arange(C)[None, None, :]) & valid[:, :, None],
            axis=1,
        )
        z = jnp.broadcast_to(hit[:, :, None, None], (B, C, H, W)).astype(
            jnp.float32
        )
        ref = jnp.mean(
            jnp.maximum(x, 0.0) - x * z + jnp.log1p(jnp.exp(-jnp.abs(x)))
        )
        assert jnp.allclose(loss, ref, rtol=1e-5, atol=1e-6), (
            float(loss),
            float(ref),
        )

    # lane-aligned H*W -> compact [R,1] target path, no pad, 2-step grid
    run_case(2, 4, 16, 16, 2, [[0, 2, -1], [3, -1, -1]])
    # non-lane-aligned H*W -> dense-target fallback, ragged last block + mask
    run_case(2, 4, 12, 12, 2, [[1, -1, -1], [0, 3, -1]])

    print("KERNEL_OK")
</pallas_src>

<mosaic_0001>
module attributes {stable_mosaic.version = 11 : i64} {
  func.func @_dual_att_loss_kernel(%arg0: i32, %arg1: memref<8x128xf32, #tpu.memory_space<vmem>>, %arg2: memref<8x128xf32, #tpu.memory_space<vmem>>, %arg3: memref<8x1xf32, #tpu.memory_space<vmem>>, %arg4: memref<1x8x128xf32, #tpu.memory_space<vmem>>) attributes {dimension_semantics = [#tpu.dimension_semantics<parallel>], iteration_bounds = array<i64: 2>, scalar_prefetch = 0 : i64, scratch_operands = 0 : i64, tpu.core_type = #tpu.core_type<tc>, window_params = [{transform_indices = @transform_0, window_bounds = array<i64: 8, 128>}, {transform_indices = @transform_1, window_bounds = array<i64: 8, 128>}, {transform_indices = @transform_2, window_bounds = array<i64: 8, 1>}, {transform_indices = @transform_3, window_bounds = array<i64: 1, 8, 128>}]} {
    %c0 = arith.constant 0 : index
    %c0_0 = arith.constant 0 : index
    %0 = vector.load %arg1[%c0, %c0_0] : memref<8x128xf32, #tpu.memory_space<vmem>>, vector<8x128xf32>
    %c0_1 = arith.constant 0 : index
    %c0_2 = arith.constant 0 : index
    %1 = vector.load %arg2[%c0_1, %c0_2] : memref<8x128xf32, #tpu.memory_space<vmem>>, vector<8x128xf32>
    %2 = arith.addf %0, %1 : vector<8x128xf32>
    %cst = arith.constant 5.000000e-01 : f32
    %3 = vector.broadcast %cst : f32 to vector<8x128xf32>
    %4 = arith.mulf %2, %3 : vector<8x128xf32>
    %c0_3 = arith.constant 0 : index
    %c0_4 = arith.constant 0 : index
    %5 = vector.load %arg3[%c0_3, %c0_4] : memref<8x1xf32, #tpu.memory_space<vmem>>, vector<8x1xf32>
    %cst_5 = arith.constant 0.000000e+00 : f32
    %6 = vector.broadcast %cst_5 : f32 to vector<8x128xf32>
    %7 = arith.maximumf %4, %6 : vector<8x128xf32>
    %8 = vector.broadcast %5 : vector<8x1xf32> to vector<8x128xf32>
    %9 = arith.mulf %4, %8 : vector<8x128xf32>
    %10 = arith.subf %7, %9 : vector<8x128xf32>
    %11 = math.absf %4 : vector<8x128xf32>
    %cst_6 = arith.constant 0.000000e+00 : f32
    %12 = vector.broadcast %cst_6 : f32 to vector<8x128xf32>
    %13 = arith.subf %12, %11 : vector<8x128xf32>
    %14 = math.exp %13 : vector<8x128xf32>
    %15 = math.log1p %14 : vector<8x128xf32>
    %16 = arith.addf %10, %15 : vector<8x128xf32>
    %17 = vector.shape_cast %16 : vector<8x128xf32> to vector<1x8x128xf32>
    %cst_7 = arith.constant dense<0.000000e+00> : vector<8x128xf32>
    %18 = vector.multi_reduction <add>, %17, %cst_7 [0] : vector<1x8x128xf32> to vector<8x128xf32>
    %19 = vector.shape_cast %18 : vector<8x128xf32> to vector<1x8x128xf32>
    %c0_8 = arith.constant 0 : index
    %c0_9 = arith.constant 0 : index
    %c0_10 = arith.constant 0 : index
    %20 = vector.load %arg4[%c0_8, %c0_9, %c0_10] : memref<1x8x128xf32, #tpu.memory_space<vmem>>, vector<1x8x128xf32>
    tpu.vector_store %arg4[%c0_8, %c0_9, %c0_10], %19 {strides = array<i32>} : memref<1x8x128xf32, #tpu.memory_space<vmem>>, vector<1x8x128xf32>,
    return
  }
  func.func @transform_0(%arg0: i32) -> (i32, i32) {
    %c0_i32 = arith.constant 0 : i32
    %c0_i32_0 = arith.constant 0 : i32
    return %arg0, %c0_i32 : i32, i32
  }
  func.func @transform_1(%arg0: i32) -> (i32, i32) {
    %c0_i32 = arith.constant 0 : i32
    %c0_i32_0 = arith.constant 0 : i32
    return %arg0, %c0_i32 : i32, i32
  }
  func.func @transform_2(%arg0: i32) -> (i32, i32) {
    %c0_i32 = arith.constant 0 : i32
    %c0_i32_0 = arith.constant 0 : i32
    return %arg0, %c0_i32 : i32, i32
  }
  func.func @transform_3(%arg0: i32) -> (i32, i32, i32) {
    %c0_i32 = arith.constant 0 : i32
    %c0_i32_0 = arith.constant 0 : i32
    %c0_i32_1 = arith.constant 0 : i32
    return %arg0, %c0_i32, %c0_i32_0 : i32, i32, i32
  }
}

</mosaic_0001>

<bundles_post_ra>
// kernel: tpu_custom_call.1
= control target key start
LH: loop header
LB: loop body
LE: loop exit
PB: predicated region body
PF: predicated region fallthrough
CT: control target
= control target key end

     0   :  { %8 = vsyncpa [#allocation3], 0  ;;  %s693_s0 = inlined_call_operand.vmem [shape: f32[16,128], index: 0, kind: input, shape index: {}]   ;;  %s694_s1 = inlined_call_operand.hbm [shape: f32[16,128], index: 1, kind: input, shape index: {}]   ;;  %s695_s2 = inlined_call_operand.vmem [shape: f32[16,1], index: 2, kind: input, shape index: {}]   ;;  %s696_s3 = inlined_call_operand.hbm [shape: f32[2,8,128], index: 3, kind: output, shape index: {}]  }
   0x1   :  { %10 = vsyncpa [#allocation3 + $0x1], 0 }
   0x2   :  { %11 = vsyncpa [#allocation4], 0 }
   0x3   :  { %13 = vsyncpa [#allocation4 + $0x1], 0  ;;  %s540_s12 = smov 0   ;;  %s542_s13 = smov 0  }
   0x4   :  { %s544_s14 = smov 0   ;;  %s546_s15 = smov 0  }
   0x5 LB: > { %s561_s16 = sadd.s32 4294967295, %s515_s15   ;;  %s357_s17 = sadd.s32 4294967294, %s515_s15   ;;  %s515_s15 = sphi %s546_s15, %s713_s15   ;;  %s511_s14 = sphi %s544_s14, %s712_s14   ;;  %s507_s13 = sphi %s542_s13, %s711_s13   ;;  %s503_s12 = sphi %s540_s12, %s710_s12  }
   0x6   : > { %s565_s18 = sadd.s32 1, %s515_s15   ;;  %s52_s19 = sadd.s32 1, %s511_s14 }
   0x7   : > { %s49_s20 = ssub.s32 %s515_s15, %s565_s18  ;;  %p59_p0 = scmp.ne.s32.totalorder %s511_s14, %s507_s13 }
   0x8   : > { %p50_p1 = scmp.eq.s32.totalorder %s49_s20, 0  ;;  %p60_p2 = scmp.eq.s32.totalorder %s515_s15, 0 }
   0x9   : > { %p65_p3 = scmp.ne.s32.totalorder %s507_s13, %s503_s12  ;;  %p66_p4 = scmp.eq.s32.totalorder %s561_s16, 0 }
   0xa   : > { %s577_s21 = scalar_select %p50_p1, %s511_s14, %s52_s19  }
   0xb   : > { %p579_p5 = por %p60_p2, %p59_p0  ;;  %p583_p6 = por %p66_p4, %p65_p3 }
   0xc   : > { %p115_p7 = scmp.eq.s32.totalorder %s561_s16, 1  ;;  %p121_p8 = scmp.eq.s32.totalorder %s357_s17, 1 }
   0xd   : > { %s700_s23 = scalar_select %p583_p6, 1, 0 }
   0xe   : > { %p383_p10 = scmp.lt.s32.totalorder %s515_s15, 2  ;;  %p590_p11 = por %p115_p7, %p59_p0 }
   0xf   : > { %p594_p12 = por %p121_p8, %p65_p3  ;;  %s148_s26 = sand.u32 1, %s511_s14  }
  0x10   : > { %s701_s24 = scalar_select %p590_p11, 1, 0 }
  0x11   : > { %s702_s25 = scalar_select %p594_p12, 1, 0 }
  0x12   : > { %s361_s27 = sshll.u32 %s515_s15, 7  ;;  %s360_s28 = sshll.u32 %s148_s26, 3 }
  0x13   : > { %s603_s4 = scalar_lea.hbm %s694_s1, %s361_s27  ;;  %s152_s5 = scalar_lea.vmem [#allocation2], %s360_s28 }
  0x14   : > { %s159_s6 = sshll.u32 %s152_s5, 4  ;;  %p607_p13 = pnand %p383_p10, %p579_p5  ;;  %s611_s6 = int_to_ptr.vmem [resolvable:$true] %s159_s6 }
  0x15   : > { %s149_s8 = scalar_lea.sflag [#allocation3], %s148_s26  ;;  %s423_s9 = scalar_lea.hbm %s603_s4, 128 }
  0x16   : > { %p424_p2 = scmp.ne.s32.totalorder %s603_s4, %s423_s9  ;;  %p425_p3 = pneg %p607_p13 }
  0x17   : > { %s428_s17 = scalar_lea.hbm %s694_s1, 256  ;;  %p429_p5 = scmp.lt.s32.totalorder %s603_s4, %s694_s1 }
  0x18   : > { %p426_p4 = pnand %p425_p3, %p424_p2  ;;  %p430_p8 = scmp.lt.s32.totalorder %s428_s17, %s423_s9 }
  0x1a   : > { %p427_p7 = pneg %p426_p4  ;;  %p431_p10 = por %p430_p8, %p429_p5 }
  0x1c   : > { %p432_p9 = pnand %p431_p10, %p427_p7 }
  0x1e   : > { %435 = shalt.err (!%p432_p9)
}
  0x1f   : > { %s436_s22 = scalar_lea.vmem %s611_s6, 128  ;;  %s517_s26 = smov [#allocation2]  }
  0x20   : > { %p437_p0 = scmp.ne.s32.totalorder %s611_s6, %s436_s22  ;;  %s441_s27 = sshll.u32 %s517_s26, 4  ;;  %s442_s27 = int_to_ptr.vmem [resolvable:$false] %s441_s27 }
  0x21   : > { %s443_s28 = scalar_lea.vmem %s442_s27, 256  ;;  %p444_p4 = scmp.lt.s32.totalorder %s611_s6, %s442_s27 }
  0x22   : > { %p439_p1 = pnand %p437_p0, %p425_p3  ;;  %p445_p12 = scmp.lt.s32.totalorder %s443_s28, %s436_s22 }
  0x24   : > { %p440_p2 = pneg %p439_p1  ;;  %p446_p11 = por %p445_p12, %p444_p4 }
  0x26   : > { %p447_p6 = pnand %p446_p11, %p440_p2 }
  0x28   : > { %450 = shalt.err (!%p447_p6)
}
  0x29   : > { %378 = dma.hbm_to_vmem [thread:$0]  (!%p607_p13), %s603_s4, 128, %s611_s6, %s149_s8  }
  0x2a   : > { %p704_p9 = scmp.lt.s32.totalorder %s515_s15, 3  ;;  %p705_p7 = scmp.ge.s32.totalorder %s515_s15, 1 }
  0x2c   : > { %p172_p0 = pnand %p705_p7, %p704_p9 }
  0x2d   : > { %s638_s29 = sand.u32 (!%p172_p0), 1, %s507_s13   ;;  %p706_p6 = scmp.ne.s32.totalorder (!%p172_p0), %s700_s23, 0 }
  0x2e   : > { %175 = sbr.rel (%p172_p0) target bundleno = 202 (0xca), region = 32  ;;  %s363_s30 = sshll.u32 (!%p172_p0), %s638_s29, 3 }
  0x2f   : > { %s178_s5 = scalar_lea.sflag (!%p172_p0), [#allocation3], %s638_s29  ;;  %s181_s7 = scalar_lea.vmem (!%p172_p0), [#allocation2], %s363_s30 }
  0x33   : > { %494 = dma.done.wait (%p706_p6), %s178_s5, 128  }
  0x34   : > { %496 = vsyncadd (%p706_p6), %s178_s5, 4294967168  ;;  %p212_p11 = scmp.lt.s32.totalorder %s561_s16, 1  ;;  %v518_v0 = vmov 0   ;;  %v221_v3 = vld [vmem:[%s181_s7] sm:$0xff]  ;;  %s368_s23 = sshll.u32 %s561_s16, 7 }
  0x35   : > { %418 = vset.pattern.permute.xlu0 %v518_v0  ;;  %s211_s20 = scalar_lea.vmem [#allocation5], %s363_s30  ;;  %s261_s28 = scalar_lea.hbm %s696_s3, %s368_s23 }
  0x36   : > { %s213_s4 = scalar_select %p212_p11, %s561_s16, 1 }
  0x37   : > { %s263_s22 = sshll.u32 %s211_s20, 4  ;;  %s250_s5 = scalar_lea.sflag [#allocation4], %s638_s29  ;;  %s264_s22 = int_to_ptr.vmem [resolvable:$true] %s263_s22 }
  0x38   : > { %s365_s6 = sshll.u32 %s213_s4, 3  ;;  %s451_s7 = scalar_lea.vmem %s264_s22, 128 }
  0x39   : > { %s219_s10 = scalar_lea.vmem %s695_s2, %s365_s6  ;;  %s215_s19 = scalar_lea.vmem %s693_s0, %s365_s6 }
  0x3a   : > { %v224_v1 = vld [vmem:[%s219_s10] sm:$0xff]  ;;  %p452_p12 = scmp.ne.s32.totalorder %s264_s22, %s451_s7  ;;  %p707_p13 = scmp.ne.s32.totalorder %s701_s24, 0 }
  0x3b   : > { %228 = vperm.xlu0 %418, %v224_v1   ;;  %v220_v2 = vld [vmem:[%s215_s19] sm:$0xff]  ;;  %s519_s4 = smov [#allocation5]  }
  0x3c   : > { %v222_v4 = vadd.f32 %v221_v3, %v220_v2  ;;  %p453_p1 = pnand %p452_p12, %p707_p13  ;;  %s455_s6 = sshll.u32 %s519_s4, 4  ;;  %s456_s6 = int_to_ptr.vmem [resolvable:$false] %s455_s6 }
  0x3d   : > { %s457_s16 = scalar_lea.vmem %s456_s6, 256  ;;  %p458_p5 = scmp.lt.s32.totalorder %s264_s22, %s456_s6 }
  0x3e   : > { %v223_v5 = vmul.f32 0.5, %v222_v4  ;;  %p454_p3 = pneg %p453_p1  ;;  %p459_p8 = scmp.lt.s32.totalorder %s457_s16, %s451_s7 }
  0x40   : > { %v233_v6 = vand.u32 2147483647, %v223_v5  ;;  %v225_v17 = vmax.f32 %v223_v5, 0.0  ;;  %p460_p10 = por %p459_p8, %p458_p5 }
  0x42   : > { %v234_v7 = vsub.f32 0.0, %v233_v6  ;;  %p461_p2 = pnand %p460_p10, %p454_p3 }
  0x44   : > { %v235_v8 = vmul.f32 1.442695, %v234_v7 }
  0x46   : > { %419 = vpow2.f32 %v235_v8 }
  0x53   : > { %v420_v9 = vpop.eup %419 }
  0x54   : > { %v237_v10 = vadd.f32 1.0, %v420_v9  ;;  %v240_v11 = vmul.f32 -0.5, %v420_v9  ;;  %v243_v14 = vand.u32 2147483647, %v420_v9 }
  0x56   : > { %421 = vlog2.f32 %v237_v10  ;;  %v241_v12 = vadd.f32 1.0, %v240_v11  ;;  %vm244_vm0 = vcmp.lt.f32.partialorder %v243_v14, 0.0004427343 }
  0x58   : > { %v242_v16 = vmul.f32 %v420_v9, %v241_v12 }
  0x63   : > { %v422_v13 = vpop.eup %421 }
  0x64   : > { %v239_v15 = vmul.f32 0.6931472, %v422_v13 }
  0x66   : > { %v245_v20 = vsel %vm244_vm0, %v242_v16, %v239_v15 }
  0xb6   : > { %v229_v18 = vpop.permute.xlu0 %228 }
  0xb7   : > { %v231_v19 = vmul.f32 %v229_v18, %v223_v5 }
  0xb9   : > { %v232_v21 = vsub.f32 %v225_v17, %v231_v19 }
  0xbb   : > { %v246_v22 = vadd.f32 %v245_v20, %v232_v21 }
  0xbd   : > { %248 = vst [vmem:[%s211_s20] sm:$0xff] %v246_v22 }
  0xbe   : > { %464 = shalt.err (!%p461_p2)
}
  0xbf   : > { %s465_s30 = scalar_lea.hbm %s261_s28, 128  ;;  %s469_s9 = scalar_lea.hbm %s696_s3, 256 }
  0xc0   : > { %p466_p4 = scmp.ne.s32.totalorder %s261_s28, %s465_s30  ;;  %p470_p0 = scmp.lt.s32.totalorder %s261_s28, %s696_s3 }
  0xc1   : > { %p471_p6 = scmp.lt.s32.totalorder %s469_s9, %s465_s30 }
  0xc2   : > { %p467_p9 = pnand %p466_p4, %p707_p13 }
  0xc3   : > { %p472_p11 = por %p471_p6, %p470_p0 }
  0xc4   : > { %p468_p7 = pneg %p467_p9 }
  0xc6   : > { %p473_p12 = pnand %p472_p11, %p468_p7 }
  0xc8   : > { %476 = shalt.err (!%p473_p12)
}
  0xc9   : > { %373 = dma.vmem_to_hbm [thread:$0]  (%p707_p13), %s264_s22, 128, %s261_s28, %s250_s5  }
  0xca PF: > { %s275_s17 = sand.u32 1, %s503_s12   ;;  %p708_p1 = scmp.ne.s32.totalorder %s702_s25, 0 }
  0xcb   : > { %p709_p3 = scmp.ge.s32.totalorder %s515_s15, 2  ;;  %s276_s19 = scalar_lea.sflag [#allocation4], %s275_s17 }
  0xcd   : > { %p380_p5 = pnand %p709_p3, %p708_p1 }
  0xcf   : > { %p381_p8 = pneg %p380_p5 }
  0xd1   : > { %498 = dma.done.wait (%p381_p8), %s276_s19, 128  }
  0xd2   : > { %500 = vsyncadd (%p381_p8), %s276_s19, 4294967168  ;;  %p16_p10 = scmp.ge.s32.totalorder %s565_s18, 4   ;;  %s710_s12 = smov %s507_s13 }
  0xd3   : > { %s711_s13 = smov %s511_s14  ;;  %s712_s14 = smov %s577_s21 }
  0xd4   : > { %s713_s15 = smov %s565_s18  ;;  %18 = sbr.rel (!%p16_p10) target bundleno = 5 (0x5), region = 83 }
  0xd9   :  { %281 = vsyncpa [#allocation3], 1 }
  0xda   :  { %283 = vsyncpa [#allocation3 + $0x1], 1 }
  0xdb   :  { %284 = vsyncpa [#allocation4], 1 }
  0xdc   :  { %286 = vsyncpa [#allocation4 + $0x1], 1 }

</bundles_post_ra>
